<compile_context>
chip_gen: v6e
topology: v6e:2x2x1
jax: 0.10.0
libtpu: 0.0.40
codegen_flags: <defaults>
</compile_context>

<pallas_src>
import functools
import math

import jax
import jax.numpy as jnp
from jax import lax
from jax.experimental import pallas as pl
from jax.experimental.pallas import tpu as pltpu


def _cdiv(a, b):
    return -(-a // b)


def _round_up(x, m):
    return _cdiv(x, m) * m


def _default_compute_dtype():
    """bf16 VPU/EUP exists on v6e / v7x; keep f32 on v5e and older."""
    try:
        kind = jax.devices()[0].device_kind.lower()
    except Exception:  # pragma: no cover - no devices at trace time
        return jnp.float32
    if any(tag in kind for tag in ("v6", "v7", "tpu7", "7x")):
        return jnp.bfloat16
    return jnp.float32


def _batch_tiling(m, *, cap=4096, min_steps=2):
    """Lane-dense batch tile (multiple of 128), padded batch, with
    - tile <= cap (cap=4096 -> act tiles are <=512 KiB f32, ~MiBs total VMEM),
    - >=2 grid steps whenever there is more than one 128-block (v7x dual-TC),
    - padding bounded to < one extra 128-block beyond 128-alignment."""
    m128 = _round_up(max(m, 1), 128)
    blocks = m128 // 128
    cap_blocks = cap // 128
    steps = max(min_steps if blocks > 1 else 1, _cdiv(blocks, cap_blocks))
    tile_blocks = _cdiv(blocks, steps)
    steps = _cdiv(blocks, tile_blocks)
    tm = tile_blocks * 128
    return tm, steps * tm


# ----------------------------------------------------------------------------
# Fused kernel: one batch tile through the entire MLP.
# ----------------------------------------------------------------------------
def _fused_mlp_kernel(x_ref, w0_ref, b0_ref, wh_ref, bh_ref, wl_ref, bl_ref,
                      o_ref, *, num_hidden, residual, compute_dtype):
    # x_ref: (TM, K0) batch-major tile.  First layer contracts over K0 of both
    # operands (A @ B^T form) -> (H, TM): batch lands on lanes, no wrapper
    # transpose needed.  Dots accumulate in f32; tanh runs in compute_dtype
    # (bf16 on v6e/v7x, f32 on v5e).
    x = x_ref[...].astype(compute_dtype)
    z = lax.dot_general(
        w0_ref[...], x, (((1,), (1,)), ((), ())),
        preferred_element_type=jnp.float32) + b0_ref[...]
    act = jnp.tanh(z.astype(compute_dtype))
    # Hidden layers stacked into one (L, H, H) ref; L is tiny (2-3) so a
    # statically unrolled loop keeps the lowering trivial.
    for l in range(num_hidden):
        z = jnp.dot(wh_ref[l], act,
                    preferred_element_type=jnp.float32) + bh_ref[l]
        z = jnp.tanh(z.astype(compute_dtype))
        act = z + act if residual else z
    o_ref[...] = (
        jnp.dot(wl_ref[...], act, preferred_element_type=jnp.float32)
        + bl_ref[...]
    ).astype(o_ref.dtype)


# ----------------------------------------------------------------------------
# Net.forward (tanh activation).  params: list of (w, b) with PyTorch
# nn.Linear layout w:(out, in), b:(out,).
# ----------------------------------------------------------------------------
@functools.partial(jax.jit, static_argnames=("configuration", "compute_dtype"))
def net_forward(params, x, configuration, compute_dtype=None):
    if configuration not in ("resnet", "DNN"):
        raise ValueError(configuration)
    if compute_dtype is None:
        compute_dtype = _default_compute_dtype()
    cdt = jnp.dtype(compute_dtype)

    (w0, b0), (wl, bl) = params[0], params[-1]
    hidden = params[1:-1]
    h, k0 = w0.shape
    n_out = wl.shape[0]
    for w, _ in hidden:
        # Fused kernel stacks hidden weights -> requires equal hidden widths
        # (always true for resnet; typical for PINN-style DNNs).
        assert w.shape == (h, h), "hidden layers must all be (H, H)"
    assert wl.shape == (n_out, h)

    num_hidden = len(hidden)
    # Explicit casts: weights -> compute dtype, biases -> f32 (added to the
    # f32 accumulator), so params/x dtype mismatches can't silently mix.
    w0c = w0.astype(cdt)
    wlc = wl.astype(cdt)
    b0c = b0.astype(jnp.float32)[:, None]
    blc = bl.astype(jnp.float32)[:, None]
    if num_hidden > 0:
        wh = jnp.stack([w for w, _ in hidden]).astype(cdt)                  # (L,H,H)
        bh = jnp.stack([b for _, b in hidden]).astype(jnp.float32)[:, :, None]
    else:  # keep block shapes non-empty; loop body is statically skipped
        wh = jnp.zeros((1, h, h), cdt)
        bh = jnp.zeros((1, h, 1), jnp.float32)
    lw = wh.shape[0]

    m = x.shape[0]
    tm, m_pad = _batch_tiling(m)
    # Batch-major input; only zero-pad the batch axis when needed (no
    # wrapper-side transpose: the kernel contracts over K0 directly).
    xp = x if m_pad == m else jnp.pad(x, ((0, m_pad - m), (0, 0)))

    flops = 2 * m_pad * (k0 * h + num_hidden * h * h + h * n_out)
    transcendentals = m_pad * h * (1 + num_hidden)
    n_weight_bytes = cdt.itemsize * (h * k0 + lw * h * h + n_out * h) \
        + 4 * (h + lw * h + n_out)
    bytes_accessed = 4 * (k0 * m_pad + n_out * m_pad) + n_weight_bytes

    kernel = functools.partial(
        _fused_mlp_kernel,
        num_hidden=num_hidden,
        residual=(configuration == "resnet"),
        compute_dtype=cdt,
    )
    out = pl.pallas_call(
        kernel,
        out_shape=jax.ShapeDtypeStruct((n_out, m_pad), x.dtype),
        grid=(m_pad // tm,),
        in_specs=[
            pl.BlockSpec((tm, k0), lambda i: (i, 0)),        # x tile (batch-major)
            pl.BlockSpec((h, k0), lambda i: (0, 0)),         # first W (resident)
            pl.BlockSpec((h, 1), lambda i: (0, 0)),          # first b
            pl.BlockSpec((lw, h, h), lambda i: (0, 0, 0)),   # hidden Ws
            pl.BlockSpec((lw, h, 1), lambda i: (0, 0, 0)),   # hidden bs
            pl.BlockSpec((n_out, h), lambda i: (0, 0)),      # last W
            pl.BlockSpec((n_out, 1), lambda i: (0, 0)),      # last b
        ],
        out_specs=pl.BlockSpec((n_out, tm), lambda i: (0, i)),  # lane-dense out
        compiler_params=pltpu.CompilerParams(
            dimension_semantics=("parallel",),
        ),
        cost_estimate=pl.CostEstimate(
            flops=flops,
            transcendentals=transcendentals,
            bytes_accessed=bytes_accessed,
        ),
    )(xp, w0c, b0c, wh, bh, wlc, blc)

    return out[:, :m].T                                       # (batch, n_out)


# ----------------------------------------------------------------------------
# Parameter init (PyTorch nn.Linear default) and pure-JAX reference.
# ----------------------------------------------------------------------------
def init_params(layer_sizes, key):
    """nn.Linear default init: U(-1/sqrt(fan_in), 1/sqrt(fan_in)); w:(out,in)."""
    params = []
    for fan_in, fan_out in zip(layer_sizes[:-1], layer_sizes[1:]):
        key, kw, kb = jax.random.split(key, 3)
        bound = 1.0 / math.sqrt(fan_in)
        w = jax.random.uniform(kw, (fan_out, fan_in), jnp.float32, -bound, bound)
        b = jax.random.uniform(kb, (fan_out,), jnp.float32, -bound, bound)
        params.append((w, b))
    return params


def net_forward_ref(params, x, configuration):
    """Pure-JAX mirror of the PyTorch forward."""
    if configuration == "resnet":
        w, b = params[0]
        y = jnp.tanh(x @ w.T + b)
        for w, b in params[1:-1]:
            y = jnp.tanh(y @ w.T + b) + y
        w, b = params[-1]
        return y @ w.T + b
    # DNN
    for w, b in params[:-1]:
        x = jnp.tanh(x @ w.T + b)
    w, b = params[-1]
    return x @ w.T + b


if __name__ == "__main__":
    layer_sizes = [2, 32, 32, 32, 1]   # typical PINN MLP: (x, t) -> u
    key = jax.random.PRNGKey(0)
    params = init_params(layer_sizes, key)

    ok = True
    for batch in (8, 300):             # 1-step grid and 2-step (padded) grid
        key, kx = jax.random.split(key)
        x = jax.random.normal(kx, (batch, layer_sizes[0]), jnp.float32)
        ref = {cfg: net_forward_ref(params, x, cfg) for cfg in ("DNN", "resnet")}

        for cfg in ("DNN", "resnet"):
            # Exact-precision path (f32 everywhere): tight tolerance.
            out = jax.block_until_ready(
                net_forward(params, x, cfg, compute_dtype=jnp.float32))
            if out.shape != (batch, layer_sizes[-1]):
                ok = False
            if not bool(jnp.allclose(out, ref[cfg], atol=1e-5, rtol=1e-5)):
                ok = False

            # Auto path (bf16 tanh chain on v6e/v7x, f32 on v5e): loose tol.
            out_auto = jax.block_until_ready(net_forward(params, x, cfg))
            if out_auto.shape != (batch, layer_sizes[-1]):
                ok = False
            if not bool(jnp.all(jnp.isfinite(out_auto))):
                ok = False
            if not bool(jnp.allclose(out_auto, ref[cfg], atol=5e-2, rtol=5e-2)):
                ok = False

    print("KERNEL_OK" if ok else "KERNEL_MISMATCH")
</pallas_src>

<mosaic_0001>
module attributes {stable_mosaic.version = 11 : i64} {
  func.func @_fused_mlp_kernel(%arg0: i32, %arg1: memref<128x2xf32, #tpu.memory_space<vmem>>, %arg2: memref<32x2xf32, #tpu.memory_space<vmem>>, %arg3: memref<32x1xf32, #tpu.memory_space<vmem>>, %arg4: memref<2x32x32xf32, #tpu.memory_space<vmem>>, %arg5: memref<2x32x1xf32, #tpu.memory_space<vmem>>, %arg6: memref<1x32xf32, #tpu.memory_space<vmem>>, %arg7: memref<1x1xf32, #tpu.memory_space<vmem>>, %arg8: memref<1x128xf32, #tpu.memory_space<vmem>>) attributes {dimension_semantics = [#tpu.dimension_semantics<parallel>], iteration_bounds = array<i64: 1>, scalar_prefetch = 0 : i64, scratch_operands = 0 : i64, tpu.core_type = #tpu.core_type<tc>, window_params = [{transform_indices = @transform_0, window_bounds = array<i64: 128, 2>}, {pipeline_mode = #tpu.pipeline_mode<synchronous>, transform_indices = @transform_1, window_bounds = array<i64: 32, 2>}, {pipeline_mode = #tpu.pipeline_mode<synchronous>, transform_indices = @transform_2, window_bounds = array<i64: 32, 1>}, {pipeline_mode = #tpu.pipeline_mode<synchronous>, transform_indices = @transform_3, window_bounds = array<i64: 2, 32, 32>}, {pipeline_mode = #tpu.pipeline_mode<synchronous>, transform_indices = @transform_4, window_bounds = array<i64: 2, 32, 1>}, {pipeline_mode = #tpu.pipeline_mode<synchronous>, transform_indices = @transform_5, window_bounds = array<i64: 1, 32>}, {pipeline_mode = #tpu.pipeline_mode<synchronous>, transform_indices = @transform_6, window_bounds = array<i64: 1, 1>}, {transform_indices = @transform_7, window_bounds = array<i64: 1, 128>}]} {
    %c0 = arith.constant 0 : index
    %c0_0 = arith.constant 0 : index
    %0 = vector.load %arg1[%c0, %c0_0] : memref<128x2xf32, #tpu.memory_space<vmem>>, vector<128x2xf32>
    %c0_1 = arith.constant 0 : index
    %c0_2 = arith.constant 0 : index
    %1 = vector.load %arg2[%c0_1, %c0_2] : memref<32x2xf32, #tpu.memory_space<vmem>>, vector<32x2xf32>
    %cst = arith.constant dense<0.000000e+00> : vector<32x128xf32>
    %2 = tpu.matmul %1, %0, %cst {dimension_numbers = #tpu.dot_dimension_numbers<[1], [1], [0], [0], [0, 0, 1, 0], [], []>} : vector<32x2xf32>, vector<128x2xf32>, vector<32x128xf32> -> vector<32x128xf32>
    %c0_3 = arith.constant 0 : index
    %c0_4 = arith.constant 0 : index
    %3 = vector.load %arg3[%c0_3, %c0_4] : memref<32x1xf32, #tpu.memory_space<vmem>>, vector<32x1xf32>
    %4 = vector.broadcast %3 : vector<32x1xf32> to vector<32x128xf32>
    %5 = arith.addf %2, %4 : vector<32x128xf32>
    %6 = math.tanh %5 : vector<32x128xf32>
    %c0_5 = arith.constant 0 : index
    %c0_6 = arith.constant 0 : index
    %c0_7 = arith.constant 0 : index
    %7 = vector.load %arg4[%c0_5, %c0_6, %c0_7] : memref<2x32x32xf32, #tpu.memory_space<vmem>>, vector<1x32x32xf32>
    %8 = vector.shape_cast %7 : vector<1x32x32xf32> to vector<32x32xf32>
    %cst_8 = arith.constant dense<0.000000e+00> : vector<32x128xf32>
    %9 = tpu.matmul %8, %6, %cst_8 {dimension_numbers = #tpu.dot_dimension_numbers<[1], [0], [0], [1], [0, 0, 1, 1], [], []>} : vector<32x32xf32>, vector<32x128xf32>, vector<32x128xf32> -> vector<32x128xf32>
    %c0_9 = arith.constant 0 : index
    %c0_10 = arith.constant 0 : index
    %c0_11 = arith.constant 0 : index
    %10 = vector.load %arg5[%c0_9, %c0_10, %c0_11] : memref<2x32x1xf32, #tpu.memory_space<vmem>>, vector<1x32x1xf32>
    %11 = vector.shape_cast %10 : vector<1x32x1xf32> to vector<32x1xf32>
    %12 = vector.broadcast %11 : vector<32x1xf32> to vector<32x128xf32>
    %13 = arith.addf %9, %12 : vector<32x128xf32>
    %14 = math.tanh %13 : vector<32x128xf32>
    %c1 = arith.constant 1 : index
    %c0_12 = arith.constant 0 : index
    %c0_13 = arith.constant 0 : index
    %15 = vector.load %arg4[%c1, %c0_12, %c0_13] : memref<2x32x32xf32, #tpu.memory_space<vmem>>, vector<1x32x32xf32>
    %16 = vector.shape_cast %15 : vector<1x32x32xf32> to vector<32x32xf32>
    %cst_14 = arith.constant dense<0.000000e+00> : vector<32x128xf32>
    %17 = tpu.matmul %16, %14, %cst_14 {dimension_numbers = #tpu.dot_dimension_numbers<[1], [0], [0], [1], [0, 0, 1, 1], [], []>} : vector<32x32xf32>, vector<32x128xf32>, vector<32x128xf32> -> vector<32x128xf32>
    %c1_15 = arith.constant 1 : index
    %c0_16 = arith.constant 0 : index
    %c0_17 = arith.constant 0 : index
    %18 = vector.load %arg5[%c1_15, %c0_16, %c0_17] : memref<2x32x1xf32, #tpu.memory_space<vmem>>, vector<1x32x1xf32>
    %19 = vector.shape_cast %18 : vector<1x32x1xf32> to vector<32x1xf32>
    %20 = vector.broadcast %19 : vector<32x1xf32> to vector<32x128xf32>
    %21 = arith.addf %17, %20 : vector<32x128xf32>
    %22 = math.tanh %21 : vector<32x128xf32>
    %c0_18 = arith.constant 0 : index
    %c0_19 = arith.constant 0 : index
    %23 = vector.load %arg6[%c0_18, %c0_19] : memref<1x32xf32, #tpu.memory_space<vmem>>, vector<1x32xf32>
    %cst_20 = arith.constant dense<0.000000e+00> : vector<1x128xf32>
    %24 = tpu.matmul %23, %22, %cst_20 {dimension_numbers = #tpu.dot_dimension_numbers<[1], [0], [0], [1], [0, 0, 1, 1], [], []>} : vector<1x32xf32>, vector<32x128xf32>, vector<1x128xf32> -> vector<1x128xf32>
    %c0_21 = arith.constant 0 : index
    %c0_22 = arith.constant 0 : index
    %25 = vector.load %arg7[%c0_21, %c0_22] : memref<1x1xf32, #tpu.memory_space<vmem>>, vector<1x1xf32>
    %26 = vector.broadcast %25 : vector<1x1xf32> to vector<1x128xf32>
    %27 = arith.addf %24, %26 : vector<1x128xf32>
    %c0_23 = arith.constant 0 : index
    %c0_24 = arith.constant 0 : index
    %28 = vector.load %arg8[%c0_23, %c0_24] : memref<1x128xf32, #tpu.memory_space<vmem>>, vector<1x128xf32>
    tpu.vector_store %arg8[%c0_23, %c0_24], %27 {strides = array<i32>} : memref<1x128xf32, #tpu.memory_space<vmem>>, vector<1x128xf32>,
    return
  }
  func.func @transform_0(%arg0: i32) -> (i32, i32) {
    %c0_i32 = arith.constant 0 : i32
    %c0_i32_0 = arith.constant 0 : i32
    return %arg0, %c0_i32 : i32, i32
  }
  func.func @transform_1(%arg0: i32) -> (i32, i32) {
    %c0_i32 = arith.constant 0 : i32
    %c0_i32_0 = arith.constant 0 : i32
    %c0_i32_1 = arith.constant 0 : i32
    return %c0_i32, %c0_i32_0 : i32, i32
  }
  func.func @transform_2(%arg0: i32) -> (i32, i32) {
    %c0_i32 = arith.constant 0 : i32
    %c0_i32_0 = arith.constant 0 : i32
    %c0_i32_1 = arith.constant 0 : i32
    return %c0_i32, %c0_i32_0 : i32, i32
  }
  func.func @transform_3(%arg0: i32) -> (i32, i32, i32) {
    %c0_i32 = arith.constant 0 : i32
    %c0_i32_0 = arith.constant 0 : i32
    %c0_i32_1 = arith.constant 0 : i32
    %c0_i32_2 = arith.constant 0 : i32
    return %c0_i32, %c0_i32_0, %c0_i32_1 : i32, i32, i32
  }
  func.func @transform_4(%arg0: i32) -> (i32, i32, i32) {
    %c0_i32 = arith.constant 0 : i32
    %c0_i32_0 = arith.constant 0 : i32
    %c0_i32_1 = arith.constant 0 : i32
    %c0_i32_2 = arith.constant 0 : i32
    return %c0_i32, %c0_i32_0, %c0_i32_1 : i32, i32, i32
  }
  func.func @transform_5(%arg0: i32) -> (i32, i32) {
    %c0_i32 = arith.constant 0 : i32
    %c0_i32_0 = arith.constant 0 : i32
    %c0_i32_1 = arith.constant 0 : i32
    return %c0_i32, %c0_i32_0 : i32, i32
  }
  func.func @transform_6(%arg0: i32) -> (i32, i32) {
    %c0_i32 = arith.constant 0 : i32
    %c0_i32_0 = arith.constant 0 : i32
    %c0_i32_1 = arith.constant 0 : i32
    return %c0_i32, %c0_i32_0 : i32, i32
  }
  func.func @transform_7(%arg0: i32) -> (i32, i32) {
    %c0_i32 = arith.constant 0 : i32
    %c0_i32_0 = arith.constant 0 : i32
    return %c0_i32, %arg0 : i32, i32
  }
}

</mosaic_0001>

<bundles_post_ra>
// kernel: net_forward.1
= control target key start
LH: loop header
LB: loop body
LE: loop exit
PB: predicated region body
PF: predicated region fallthrough
CT: control target
= control target key end

     0   :  { %vm72_vm0 = vcmask 15360   ;;  %v756_v2 = vmov 0   ;;  %vm250_vm1 = vcmask 261120   ;;  %vm758_vm2 = vmmov 0   ;;  %s973_s0 = inlined_call_operand.vmem [shape: f32[128,2], index: 0, kind: input, shape index: {}]   ;;  %s974_s6 = inlined_call_operand.<no memory space> [shape: f32[1,1], index: 6, kind: input, shape index: {}]   ;;  %s975_s1 = inlined_call_operand.vmem [shape: f32[32,2], index: 1, kind: input, shape index: {}]   ;;  %s976_s2 = inlined_call_operand.vmem [shape: f32[32,1], index: 2, kind: input, shape index: {}]   ;;  %s977_s4 = inlined_call_operand.vmem [shape: f32[2,32,1], index: 4, kind: input, shape index: {}]   ;;  %s978_s3 = inlined_call_operand.vmem [shape: f32[2,32,32], index: 3, kind: input, shape index: {}]   ;;  %s979_s5 = inlined_call_operand.vmem [shape: f32[1,32], index: 5, kind: input, shape index: {}]   ;;  %s980_s7 = inlined_call_operand.vmem [shape: f32[1,128], index: 7, kind: output, shape index: {}]  }
   0x1   :  { %v43_v0 = vld [vmem:[%s973_s0 + $0x78] sm:$0xff]  ;;  %v42_v1 = vld [vmem:[%s973_s0 + $0x70] sm:$0xff]  ;;  %730 = vset.pattern.permute.xlu0 %v756_v2  ;;  %731 = vset.pattern.permute.xlu1 %v756_v2  ;;  %v12_v3 = vstv %s974_s6  ;;  %v41_v4 = vld [vmem:[%s973_s0 + $0x68] sm:$0xff] }
   0x2   :  { %650 = vmatprep.subr.msk.mxu0 %vm72_vm0, %v43_v0  ;;  %13 = vst [vmem:[#allocation2] sm:$0x1] %v12_v3  ;;  %v44_v5 = vld [vmem:[%s975_s1] sm:$0xff]  ;;  %v51_v6 = vld [vmem:[%s976_s2 + $0x18] sm:$0xff]  ;;  %v49_v7 = vld [vmem:[%s976_s2 + $0x8] sm:$0xff] }
   0x3   :  { %651 = vmatpush3.xpose.msk.msra.mxu0 %vm72_vm0, %v43_v0  ;;  %682 = vmatprep.mubr.msk.f32.mxu0 %vm72_vm0, %v44_v5  ;;  %v40_v8 = vld [vmem:[%s973_s0 + $0x60] sm:$0xff]  ;;  %v50_v9 = vld [vmem:[%s976_s2 + $0x10] sm:$0xff]  ;;  %v39_v11 = vld [vmem:[%s973_s0 + $0x58] sm:$0xff] }
   0x4   :  { %652 = vmatprep.subr.msk.mxu0 %vm72_vm0, %v42_v1  ;;  %69 = vperm.xlu0 %730, %v51_v6   ;;  %v48_v10 = vld [vmem:[%s976_s2] sm:$0xff]  ;;  %v229_v12 = vld [vmem:[%s977_s4 + $0x18] sm:$0xff]  ;;  %v228_v13 = vld [vmem:[%s977_s4 + $0x10] sm:$0xff] }
   0x5   :  { %59 = vperm.xlu1 %731, %v49_v7   ;;  %v38_v14 = vld [vmem:[%s973_s0 + $0x50] sm:$0xff]  ;;  %v227_v15 = vld [vmem:[%s977_s4 + $0x8] sm:$0xff]  ;;  %v226_v16 = vld [vmem:[%s977_s4] sm:$0xff] }
   0x6   :  { %v37_v17 = vld [vmem:[%s973_s0 + $0x48] sm:$0xff]  ;;  %v603_v18 = vld [vmem:[%s977_s4 + $0x38] sm:$0xff]  ;;  %v602_v19 = vld [vmem:[%s977_s4 + $0x30] sm:$0xff] }
   0x7   :  { %653 = vmatpush3.xpose.msk.msra.mxu0 %vm72_vm0, %v42_v1  ;;  %v36_v20 = vld [vmem:[%s973_s0 + $0x40] sm:$0xff]  ;;  %v601_v21 = vld [vmem:[%s977_s4 + $0x28] sm:$0xff]  ;;  %v35_v23 = vld [vmem:[%s973_s0 + $0x38] sm:$0xff] }
   0x8   :  { %654 = vmatprep.subr.msk.mxu0 %vm72_vm0, %v41_v4  ;;  %64 = vperm.xlu0 %730, %v50_v9   ;;  %v600_v22 = vld [vmem:[%s977_s4 + $0x20] sm:$0xff]  ;;  %v34_v25 = vld [vmem:[%s973_s0 + $0x30] sm:$0xff]  ;;  %v33_v26 = vld [vmem:[%s973_s0 + $0x28] sm:$0xff] }
   0x9   :  { %54 = vperm.xlu1 %731, %v48_v10   ;;  %v484_v24 = vld [vmem:[#allocation2] sm:$0x1]  ;;  %v31_v28 = vld [vmem:[%s973_s0 + $0x18] sm:$0xff]  ;;  %v30_v29 = vld [vmem:[%s973_s0 + $0x10] sm:$0xff] }
   0xa   :  { %v32_v27 = vld [vmem:[%s973_s0 + $0x20] sm:$0xff]  ;;  %v29_v30 = vld [vmem:[%s973_s0 + $0x8] sm:$0xff]  ;;  %v46_v33 = vld [vmem:[%s975_s1 + $0x10] sm:$0xff] }
   0xb   :  { %655 = vmatpush3.xpose.msk.msra.mxu0 %vm72_vm0, %v41_v4  ;;  %v28_v31 = vld [vmem:[%s973_s0] sm:$0xff]  ;;  %v45_v32 = vld [vmem:[%s975_s1 + $0x8] sm:$0xff]  ;;  %v47_v34 = vld [vmem:[%s975_s1 + $0x18] sm:$0xff] }
   0xc   :  { %656 = vmatprep.subr.msk.mxu0 %vm72_vm0, %v40_v8  ;;  %247 = vperm.xlu0 %730, %v229_v12   ;;  %v222_v35 = vld [vmem:[%s978_s3] sm:$0xff]  ;;  %v223_v52 = vld [vmem:[%s978_s3 + $0x8] sm:$0xff]  ;;  %v224_v53 = vld [vmem:[%s978_s3 + $0x10] sm:$0xff] }
   0xd   :  { %242 = vperm.xlu1 %731, %v228_v13   ;;  %696 = vmatprep.mubr.msk.f32.mxu1 %vm250_vm1, %v222_v35  ;;  %v225_v54 = vld [vmem:[%s978_s3 + $0x18] sm:$0xff]  ;;  %v596_v55 = vld [vmem:[%s978_s3 + $0x20] sm:$0xff]  ;;  %v598_v9 = vld [vmem:[%s978_s3 + $0x30] sm:$0xff] }
   0xe   :  { %v599_v10 = vld [vmem:[%s978_s3 + $0x38] sm:$0xff] }
   0xf   :  { %657 = vmatpush3.xpose.msk.msra.mxu0 %vm72_vm0, %v40_v8  ;;  %v597_v8 = vld [vmem:[%s978_s3 + $0x28] sm:$0xff] }
  0x10   :  { %658 = vmatprep.subr.msk.mxu0 %vm72_vm0, %v39_v11  ;;  %237 = vperm.xlu0 %730, %v227_v15  }
  0x11   :  { %232 = vperm.xlu1 %731, %v226_v16  }
  0x13   :  { %659 = vmatpush3.xpose.msk.msra.mxu0 %vm72_vm0, %v39_v11  ;;  %v757_v11 = vmov 0.0  }
  0x14   :  { %660 = vmatprep.subr.msk.mxu0 %vm72_vm0, %v38_v14  ;;  %379 = vperm.xlu0 %730, %v603_v18  }
  0x15   :  { %374 = vperm.xlu1 %731, %v602_v19  }
  0x17   :  { %661 = vmatpush3.xpose.msk.msra.mxu0 %vm72_vm0, %v38_v14 }
  0x18   :  { %662 = vmatprep.subr.msk.mxu0 %vm72_vm0, %v37_v17  ;;  %369 = vperm.xlu0 %730, %v601_v21  }
  0x19   :  { %364 = vperm.xlu1 %731, %v600_v22  }
  0x1b   :  { %663 = vmatpush3.xpose.msk.msra.mxu0 %vm72_vm0, %v37_v17 }
  0x1c   :  { %664 = vmatprep.subr.msk.mxu0 %vm72_vm0, %v36_v20  ;;  %487 = vperm.xlu0 %730, %v484_v24  }
  0x1f   :  { %665 = vmatpush3.xpose.msk.msra.mxu0 %vm72_vm0, %v36_v20 }
  0x20   :  { %666 = vmatprep.subr.msk.mxu0 %vm72_vm0, %v35_v23 }
  0x23   :  { %667 = vmatpush3.xpose.msk.msra.mxu0 %vm72_vm0, %v35_v23 }
  0x24   :  { %668 = vmatprep.subr.msk.mxu0 %vm72_vm0, %v34_v25 }
  0x27   :  { %669 = vmatpush3.xpose.msk.msra.mxu0 %vm72_vm0, %v34_v25 }
  0x28   :  { %670 = vmatprep.subr.msk.mxu0 %vm72_vm0, %v33_v26 }
  0x2b   :  { %671 = vmatpush3.xpose.msk.msra.mxu0 %vm72_vm0, %v33_v26 }
  0x2c   :  { %672 = vmatprep.subr.msk.mxu0 %vm72_vm0, %v32_v27 }
  0x2f   :  { %673 = vmatpush3.xpose.msk.msra.mxu0 %vm72_vm0, %v32_v27  ;;  %v483_v27 = vld [vmem:[%s979_s5] sm:$0x1] }
  0x30   :  { %674 = vmatprep.subr.msk.mxu0 %vm72_vm0, %v31_v28 }
  0x33   :  { %675 = vmatpush3.xpose.msk.msra.mxu0 %vm72_vm0, %v31_v28 }
  0x34   :  { %676 = vmatprep.subr.msk.mxu0 %vm72_vm0, %v30_v29 }
  0x37   :  { %677 = vmatpush3.xpose.msk.msra.mxu0 %vm72_vm0, %v30_v29  ;;  %v490_v29 = vlaneseq }
  0x38   :  { %678 = vmatprep.subr.msk.mxu0 %vm72_vm0, %v29_v30 }
  0x3b   :  { %679 = vmatpush3.xpose.msk.msra.mxu0 %vm72_vm0, %v29_v30  ;;  %v491_v30 = vshrl.u32 %v490_v29, 7 }
  0x3c   :  { %680 = vmatprep.subr.msk.mxu0 %vm72_vm0, %v28_v31 }
  0x3f   :  { %681 = vmatpush3.xpose.msk.msra.mxu0 %vm72_vm0, %v28_v31  ;;  %v492_v31 = vsub.s32 0, %v491_v30 }
  0x42   :  { %683 = vmatmul.mubr.msk.f32.vlgmr.msra.gmra.mxu0 %vm72_vm0, %v45_v32 }
  0x43   :  { %685 = vmatprep.mubr.msk.f32.mxu0 %vm72_vm0, %v46_v33 }
  0x46   :  { %686 = vmatmul.mubr.msk.f32.gmra.mxu0 %vm72_vm0, %v47_v34 }
  0x7f   :  { %v70_v36 = vpop.permute.xlu0 %69 }
  0x80   :  { %v60_v38 = vpop.permute.xlu1 %59 }
  0x83   :  { %v65_v42 = vpop.permute.xlu0 %64 }
  0x84   :  { %v55_v46 = vpop.permute.xlu1 %54 }
  0x87   :  { %v248_v56 = vpop.permute.xlu0 %247 }
  0x88   :  { %v243_v58 = vpop.permute.xlu1 %242 }
  0x8b   :  { %v238_v62 = vpop.permute.xlu0 %237 }
  0x8c   :  { %v233_v2 = vpop.permute.xlu1 %232 }
  0x8f   :  { %v380_v12 = vpop.permute.xlu0 %379 }
  0x90   :  { %v375_v14 = vpop.permute.xlu1 %374 }
  0x93   :  { %v370_v18 = vpop.permute.xlu0 %369 }
  0x94   :  { %v365_v22 = vpop.permute.xlu1 %364 }
  0x97   :  { %v488_v32 = vpop.permute.xlu0 %487 }
  0x98   :  { %v493_v33 = vrot.slane %v488_v32, %v492_v31 }
 0x102   :  { %v684_v37 = vpop.f32.mrf.mxu0 }
 0x103   :  { %v205_v44 = vadd.f32 %v684_v37, %v60_v38 }
 0x104   :  { %v199_v39 = vpop.f32.mrf.mxu0 }
 0x105   :  { %v200_v47 = vadd.f32 %v199_v39, %v55_v46 }
 0x106   :  { %v687_v40 = vpop.f32.mrf.mxu0 }
 0x107   :  { %v215_v41 = vadd.f32 %v687_v40, %v70_v36 }
 0x108   :  { %v209_v43 = vpop.f32.mrf.mxu0 }
 0x109   :  { %732 = vtanh.f32 %v215_v41  ;;  %v210_v45 = vadd.f32 %v209_v43, %v65_v42 }
 0x10b   :  { %734 = vtanh.f32 %v210_v45 }
 0x10c   :  { %736 = vtanh.f32 %v205_v44 }
 0x10d   :  { %738 = vtanh.f32 %v200_v47 }
 0x116   :  { %v733_v48 = vpop.eup %732 }
 0x117   :  { %688 = vmatprep.subr.mxu1 %v733_v48 }
 0x118   :  { %v735_v49 = vpop.eup %734  ;;  %689 = vmatpush3.msra.mxu1 %v733_v48 }
 0x119   :  { %690 = vmatprep.subr.mxu1 %v735_v49  ;;  %v737_v50 = vpop.eup %736 }
 0x11a   :  { %691 = vmatpush3.msra.mxu1 %v735_v49  ;;  %v739_v51 = vpop.eup %738 }
 0x11b   :  { %692 = vmatprep.subr.mxu1 %v737_v50 }
 0x11c   :  { %693 = vmatpush3.msra.mxu1 %v737_v50 }
 0x11d   :  { %694 = vmatprep.subr.mxu1 %v739_v51 }
 0x11e   :  { %695 = vmatpush3.msra.mxu1 %v739_v51 }
 0x11f   :  { %697 = vmatmul.mubr.msk.f32.vlgmr.msra.gmra.mxu1 %vm250_vm1, %v223_v52 }
 0x120   :  { %699 = vmatprep.mubr.msk.f32.mxu1 %vm250_vm1, %v224_v53 }
 0x123   :  { %700 = vmatmul.mubr.msk.f32.gmra.mxu1 %vm250_vm1, %v225_v54 }
 0x124   :  { %710 = vmatprep.mubr.msk.f32.mxu1 %vm250_vm1, %v596_v55 }
 0x1df   :  { %v698_v57 = vpop.f32.mrf.mxu1 }
 0x1e0   :  { %v335_v0 = vadd.f32 %v698_v57, %v238_v62 }
 0x1e1   :  { %v329_v59 = vpop.f32.mrf.mxu1 }
 0x1e2   :  { %v330_v3 = vadd.f32 %v329_v59, %v233_v2 }
 0x1e3   :  { %v701_v60 = vpop.f32.mrf.mxu1 }
 0x1e4   :  { %v345_v61 = vadd.f32 %v701_v60, %v248_v56 }
 0x1e5   :  { %v339_v63 = vpop.f32.mrf.mxu1 }
 0x1e6   :  { %740 = vtanh.f32 %v345_v61  ;;  %v340_v1 = vadd.f32 %v339_v63, %v243_v58 }
 0x1e8   :  { %742 = vtanh.f32 %v340_v1 }
 0x1e9   :  { %744 = vtanh.f32 %v335_v0 }
 0x1ea   :  { %746 = vtanh.f32 %v330_v3 }
 0x1f3   :  { %v741_v4 = vpop.eup %740 }
 0x1f4   :  { %702 = vmatprep.subr.mxu1 %v741_v4 }
 0x1f5   :  { %v743_v5 = vpop.eup %742  ;;  %703 = vmatpush3.msra.mxu1 %v741_v4 }
 0x1f6   :  { %704 = vmatprep.subr.mxu1 %v743_v5  ;;  %v745_v6 = vpop.eup %744 }
 0x1f7   :  { %705 = vmatpush3.msra.mxu1 %v743_v5  ;;  %v747_v7 = vpop.eup %746 }
 0x1f8   :  { %706 = vmatprep.subr.mxu1 %v745_v6 }
 0x1f9   :  { %707 = vmatpush3.msra.mxu1 %v745_v6 }
 0x1fa   :  { %708 = vmatprep.subr.mxu1 %v747_v7 }
 0x1fb   :  { %709 = vmatpush3.msra.mxu1 %v747_v7 }
 0x1fc   :  { %711 = vmatmul.mubr.msk.f32.vlgmr.msra.gmra.mxu1 %vm250_vm1, %v597_v8  ;;  %716 = vmatprep.subr.mxu1 %v757_v11 }
 0x1fd   :  { %713 = vmatprep.mubr.msk.f32.mxu1 %vm250_vm1, %v598_v9 }
 0x200   :  { %714 = vmatmul.mubr.msk.f32.gmra.mxu1 %vm250_vm1, %v599_v10 }
 0x201   :  { %724 = vmatprep.mubr.msk.f32.mxu1 %vm758_vm2, %v757_v11 }
 0x2bc   :  { %v712_v13 = vpop.f32.mrf.mxu1 }
 0x2bd   :  { %v466_v20 = vadd.f32 %v712_v13, %v370_v18 }
 0x2be   :  { %v460_v15 = vpop.f32.mrf.mxu1 }
 0x2bf   :  { %v461_v23 = vadd.f32 %v460_v15, %v365_v22 }
 0x2c0   :  { %v715_v16 = vpop.f32.mrf.mxu1 }
 0x2c1   :  { %v476_v17 = vadd.f32 %v715_v16, %v380_v12 }
 0x2c2   :  { %v470_v19 = vpop.f32.mrf.mxu1 }
 0x2c3   :  { %748 = vtanh.f32 %v476_v17  ;;  %v471_v21 = vadd.f32 %v470_v19, %v375_v14 }
 0x2c5   :  { %750 = vtanh.f32 %v471_v21 }
 0x2c6   :  { %752 = vtanh.f32 %v466_v20 }
 0x2c7   :  { %754 = vtanh.f32 %v461_v23 }
 0x2d0   :  { %v749_v24 = vpop.eup %748 }
 0x2d1   :  { %717 = vmatpush3.msra.mxu1 %v749_v24 }
 0x2d2   :  { %v751_v25 = vpop.eup %750  ;;  %718 = vmatprep.subr.mxu1 %v757_v11 }
 0x2d3   :  { %719 = vmatpush3.msra.mxu1 %v751_v25  ;;  %v753_v26 = vpop.eup %752 }
 0x2d4   :  { %720 = vmatprep.subr.mxu1 %v757_v11  ;;  %v755_v28 = vpop.eup %754 }
 0x2d5   :  { %721 = vmatpush3.msra.mxu1 %v753_v26 }
 0x2d6   :  { %722 = vmatprep.subr.mxu1 %v757_v11 }
 0x2d7   :  { %723 = vmatpush3.msra.mxu1 %v755_v28 }
 0x2d8   :  { %725 = vmatmul.mubr.msk.f32.vlgmr.msra.gmra.mxu1 %vm250_vm1, %v483_v27 }
 0x398   :  { %v563_v34 = vpop.f32.mrf.mxu1 }
 0x399   :  { %v564_v35 = vadd.f32 %v563_v34, %v493_v33 }
 0x39a   :  { %v726_v36 = vpop.f32.mrf.mxu1 }
 0x39b   :  { %567 = vst [vmem:[%s980_s7] sm:$0x1] %v564_v35 }

</bundles_post_ra>
